<compile_context>
chip_gen: v7x
topology: tpu7x:2x2x1
jax: 0.10.0
libtpu: 0.0.40
codegen_flags: <defaults>
</compile_context>

<pallas_src>
import functools

import jax
import jax.numpy as jnp
from jax.experimental import pallas as pl
from jax.experimental.pallas import tpu as pltpu

HYPERS = {
    "cutoff": 3.6,
    "max_radial": 12,
    "max_angular": 3,
    "atomic_gaussian_width": 0.2,
    "center_atom_weight": 1.0,
    "radial_basis": {"Gto": {}},
    "cutoff_function": {"ShiftedCosine": {"width": 0.3}},
}

SUBLANE = 8


def soap_in_features(types):
    n_max = HYPERS["max_radial"]
    l_max = HYPERS["max_angular"]
    return len(types) * (len(types) + 1) * n_max ** 2 // 4 * (l_max + 1)


def _default_max_tile_n():
    """2048-row tiles on v6e/v7x; 1024 on v5e and older (16 MiB scoped VMEM)."""
    try:
        kind = jax.devices()[0].device_kind.lower()
    except Exception:
        return 1024
    for old in ("v2", "v3", "v4", "v5"):
        if old in kind:
            return 1024
    return 2048


def _energy_kernel(feat_ref, w_ref, b_ref, out_ref, pooled_ref, *, n_atoms):
    # feat_ref:   [tile_n, F] VMEM tile of SOAP features (double-buffered by BlockSpec)
    # w_ref:      [1, F] VMEM weight (resident across the grid)
    # b_ref:      [1] SMEM bias scalar
    # out_ref:    [1, 1] VMEM output (resident; written once at the end)
    # pooled_ref: [pooled_rows, F] VMEM partial-sum accumulator
    i = pl.program_id(0)
    tile_n, n_feat = feat_ref.shape

    @pl.when(i == 0)
    def _():
        pooled_ref[...] = jnp.zeros_like(pooled_ref)

    feat = feat_ref[...]

    # Last tile may be ragged (n_atoms % tile_n != 0).  Pallas gives no guarantee about the
    # contents of out-of-bounds rows, so mask rows >= n_atoms before accumulating.
    # n_atoms is a static Python int -> this branch disappears when the grid divides evenly.
    if n_atoms % tile_n != 0:
        row = i * tile_n + jax.lax.broadcasted_iota(jnp.int32, (tile_n, 1), 0)
        feat = jnp.where(row < n_atoms, feat, 0.0)

    # Fold this tile into the (SUBLANE, F) accumulator using only VPU adds (no per-step
    # cross-sublane XLU reduce, no sublane-1 [1,F] layout).
    if tile_n % SUBLANE == 0 and tile_n > SUBLANE:
        feat = feat.reshape(tile_n // SUBLANE, SUBLANE, n_feat).sum(axis=0)
    pooled_ref[...] += feat

    @pl.when(i == pl.num_programs(0) - 1)
    def _():
        # Linear(F -> 1): one sublane collapse + one lane reduce, done exactly once.
        pooled = jnp.sum(pooled_ref[...], axis=0, keepdims=True)                  # (1, F)
        out_ref[...] = jnp.sum(pooled * w_ref[...], axis=1, keepdims=True) + b_ref[0]


def energy_head(features, weight, bias, max_tile_n=None):
    """features: [N, F] f32, weight: [1, F] f32, bias: [1] f32 -> [1, 1] f32 energy."""
    n_atoms, in_features = features.shape
    assert weight.shape == (1, in_features)
    if max_tile_n is None:
        max_tile_n = _default_max_tile_n()

    # Atom tile: a multiple of 8 sublanes (or the whole array if it has <= 8 rows), so the
    # feature block is always a legal (8,128)-tileable window.  The feature (lane) dim uses
    # the full unpadded width: block last-dim == array dim is legal and Mosaic pads
    # 864 -> 896 inside VMEM for free, so no wrapper-side pad/copy of the NxF array.
    if n_atoms <= SUBLANE:
        tile_n = n_atoms
    else:
        tile_n = max(SUBLANE, min(max_tile_n, (n_atoms // SUBLANE) * SUBLANE))
    grid = (pl.cdiv(n_atoms, tile_n),)
    pooled_rows = SUBLANE if tile_n % SUBLANE == 0 else tile_n

    kernel = functools.partial(_energy_kernel, n_atoms=n_atoms)

    return pl.pallas_call(
        kernel,
        out_shape=jax.ShapeDtypeStruct((1, 1), jnp.float32),
        grid_spec=pltpu.PrefetchScalarGridSpec(
            num_scalar_prefetch=0,
            grid=grid,
            in_specs=[
                pl.BlockSpec((tile_n, in_features), lambda i: (i, 0)),   # features: tiled over atoms
                pl.BlockSpec((1, in_features), lambda i: (0, 0)),        # weight: resident
                pl.BlockSpec(memory_space=pltpu.MemorySpace.SMEM),       # bias scalar
            ],
            out_specs=pl.BlockSpec((1, 1), lambda i: (0, 0)),            # resident output
            scratch_shapes=[pltpu.VMEM((pooled_rows, in_features), jnp.float32)],
        ),
        compiler_params=pltpu.CompilerParams(
            dimension_semantics=("arbitrary",),                          # atom axis is a reduction
        ),
        cost_estimate=pl.CostEstimate(
            flops=2 * n_atoms * in_features,
            transcendentals=0,
            bytes_accessed=(n_atoms + 1) * in_features * 4 + 2 * 4,
        ),
    )(features, weight, bias)


def model_forward(features, weight, bias, per_atom=False):
    """Mirrors Model.forward's 'energy' output values (single TensorBlock).

    per_atom=False path (Pallas kernel): sum over atoms, then Linear(in_features, 1).
    """
    if per_atom:
        # per-atom energies: plain JAX glue (features @ w.T + b).
        return features @ weight.T + bias
    return energy_head(features, weight, bias)


if __name__ == "__main__":
    types = [1, 6]                           # e.g. H, C
    in_features = soap_in_features(types)    # = 864 for these HYPERS

    key = jax.random.PRNGKey(0)
    k_feat, k_w, k_b, k_feat2 = jax.random.split(key, 4)

    # Synthetic SOAP features standing in for the rascaline descriptor output.
    n_atoms = 8
    features = jax.random.normal(k_feat, (n_atoms, in_features), dtype=jnp.float32)

    # Deterministic Linear(in_features, 1) init (PyTorch-style uniform(-1/sqrt(F), 1/sqrt(F))).
    bound = 1.0 / jnp.sqrt(jnp.float32(in_features))
    weight = jax.random.uniform(k_w, (1, in_features), minval=-bound, maxval=bound,
                                dtype=jnp.float32)
    bias = jax.random.uniform(k_b, (1,), minval=-bound, maxval=bound, dtype=jnp.float32)

    def ref_energy(f):
        pooled = jnp.sum(f, axis=0, keepdims=True)
        return jnp.sum(pooled * weight, axis=1, keepdims=True) + bias

    # --- single-tile path (demo-sized system) ---
    energy = jax.block_until_ready(model_forward(features, weight, bias, per_atom=False))
    assert energy.shape == (1, 1)
    assert jnp.allclose(energy, ref_energy(features), rtol=1e-5, atol=1e-4)

    # --- multi-tile + ragged-last-tile path ---
    # 20 atoms with 8-row tiles -> 3 grid steps; last tile has only 4 valid rows and must
    # be masked in-kernel (no wrapper-side row padding any more).
    n_atoms2 = 20
    features2 = jax.random.normal(k_feat2, (n_atoms2, in_features), dtype=jnp.float32)
    energy2 = jax.block_until_ready(energy_head(features2, weight, bias, max_tile_n=8))
    assert energy2.shape == (1, 1)
    assert jnp.allclose(energy2, ref_energy(features2), rtol=1e-5, atol=1e-4)

    print("KERNEL_OK")
</pallas_src>

<mosaic_0001>
module attributes {stable_mosaic.version = 11 : i64} {
  func.func @_energy_kernel(%arg0: i32, %arg1: memref<8x864xf32, #tpu.memory_space<vmem>>, %arg2: memref<1x864xf32, #tpu.memory_space<vmem>>, %arg3: memref<1xf32, #tpu.memory_space<smem>>, %arg4: memref<1x1xf32, #tpu.memory_space<vmem>>, %arg5: memref<8x864xf32, #tpu.memory_space<vmem>>) attributes {dimension_semantics = [#tpu.dimension_semantics<arbitrary>], iteration_bounds = array<i64: 1>, scalar_prefetch = 0 : i64, scratch_operands = 1 : i64, tpu.core_type = #tpu.core_type<tc>, window_params = [{transform_indices = @transform_0, window_bounds = array<i64: 8, 864>}, {pipeline_mode = #tpu.pipeline_mode<synchronous>, transform_indices = @transform_1, window_bounds = array<i64: 1, 864>}, {transform_indices = @transform_2, window_bounds = array<i64: 1>}, {pipeline_mode = #tpu.pipeline_mode<synchronous>, transform_indices = @transform_3, window_bounds = array<i64: 1, 1>}]} {
    %c0_i32 = arith.constant 0 : i32
    %0 = arith.cmpi eq, %arg0, %c0_i32 : i32
    %1 = arith.extui %0 : i1 to i32
    %c0_i32_0 = arith.constant 0 : i32
    %2 = arith.cmpi ne, %1, %c0_i32_0 : i32
    scf.if %2 {
      %cst = arith.constant 0.000000e+00 : f32
      %10 = vector.broadcast %cst : f32 to vector<8x864xf32>
      %c0_8 = arith.constant 0 : index
      %c0_9 = arith.constant 0 : index
      %11 = vector.load %arg5[%c0_8, %c0_9] : memref<8x864xf32, #tpu.memory_space<vmem>>, vector<8x864xf32>
      tpu.vector_store %arg5[%c0_8, %c0_9], %10 {strides = array<i32>} : memref<8x864xf32, #tpu.memory_space<vmem>>, vector<8x864xf32>,
    } else {
    }
    %c0 = arith.constant 0 : index
    %c0_1 = arith.constant 0 : index
    %3 = vector.load %arg1[%c0, %c0_1] : memref<8x864xf32, #tpu.memory_space<vmem>>, vector<8x864xf32>
    %c0_2 = arith.constant 0 : index
    %c0_3 = arith.constant 0 : index
    %4 = vector.load %arg5[%c0_2, %c0_3] : memref<8x864xf32, #tpu.memory_space<vmem>>, vector<8x864xf32>
    %5 = arith.addf %4, %3 : vector<8x864xf32>
    %c0_4 = arith.constant 0 : index
    %c0_5 = arith.constant 0 : index
    %6 = vector.load %arg5[%c0_4, %c0_5] : memref<8x864xf32, #tpu.memory_space<vmem>>, vector<8x864xf32>
    tpu.vector_store %arg5[%c0_4, %c0_5], %5 {strides = array<i32>} : memref<8x864xf32, #tpu.memory_space<vmem>>, vector<8x864xf32>,
    %c0_i32_6 = arith.constant 0 : i32
    %7 = arith.cmpi eq, %arg0, %c0_i32_6 : i32
    %8 = arith.extui %7 : i1 to i32
    %c0_i32_7 = arith.constant 0 : i32
    %9 = arith.cmpi ne, %8, %c0_i32_7 : i32
    scf.if %9 {
      %c0_8 = arith.constant 0 : index
      %c0_9 = arith.constant 0 : index
      %10 = vector.load %arg5[%c0_8, %c0_9] : memref<8x864xf32, #tpu.memory_space<vmem>>, vector<8x864xf32>
      %cst = arith.constant dense<0.000000e+00> : vector<864xf32>
      %11 = vector.multi_reduction <add>, %10, %cst [0] : vector<8x864xf32> to vector<864xf32>
      %12 = vector.shape_cast %11 : vector<864xf32> to vector<1x864xf32>
      %c0_10 = arith.constant 0 : index
      %c0_11 = arith.constant 0 : index
      %13 = vector.load %arg2[%c0_10, %c0_11] : memref<1x864xf32, #tpu.memory_space<vmem>>, vector<1x864xf32>
      %14 = arith.mulf %12, %13 : vector<1x864xf32>
      %cst_12 = arith.constant dense<0.000000e+00> : vector<1xf32>
      %15 = vector.multi_reduction <add>, %14, %cst_12 [1] : vector<1x864xf32> to vector<1xf32>
      %16 = vector.shape_cast %15 : vector<1xf32> to vector<1x1xf32>
      %c0_13 = arith.constant 0 : index
      %17 = memref.load %arg3[%c0_13] : memref<1xf32, #tpu.memory_space<smem>>
      %18 = vector.broadcast %17 : f32 to vector<1x1xf32>
      %19 = arith.addf %16, %18 : vector<1x1xf32>
      %c0_14 = arith.constant 0 : index
      %c0_15 = arith.constant 0 : index
      %20 = vector.load %arg4[%c0_14, %c0_15] : memref<1x1xf32, #tpu.memory_space<vmem>>, vector<1x1xf32>
      tpu.vector_store %arg4[%c0_14, %c0_15], %19 {strides = array<i32>} : memref<1x1xf32, #tpu.memory_space<vmem>>, vector<1x1xf32>,
    } else {
    }
    return
  }
  func.func @transform_0(%arg0: i32) -> (i32, i32) {
    %c0_i32 = arith.constant 0 : i32
    %c0_i32_0 = arith.constant 0 : i32
    return %arg0, %c0_i32 : i32, i32
  }
  func.func @transform_1(%arg0: i32) -> (i32, i32) {
    %c0_i32 = arith.constant 0 : i32
    %c0_i32_0 = arith.constant 0 : i32
    %c0_i32_1 = arith.constant 0 : i32
    return %c0_i32, %c0_i32_0 : i32, i32
  }
  func.func @transform_2(%arg0: i32) -> i32 {
    %c0_i32 = arith.constant 0 : i32
    %c0_i32_0 = arith.constant 0 : i32
    return %c0_i32 : i32
  }
  func.func @transform_3(%arg0: i32) -> (i32, i32) {
    %c0_i32 = arith.constant 0 : i32
    %c0_i32_0 = arith.constant 0 : i32
    %c0_i32_1 = arith.constant 0 : i32
    return %c0_i32, %c0_i32_0 : i32, i32
  }
}

</mosaic_0001>

<bundles_post_ra>
// kernel: tpu_custom_call.1
= control target key start
LH: loop header
LB: loop body
LE: loop exit
PB: predicated region body
PF: predicated region fallthrough
CT: control target
= control target key end

     0   :  { %9 = vsyncpa [#allocation5], 0  ;;  %s325_s0 = inlined_call_operand.hbm [shape: f32[8,864], index: 0, kind: input, shape index: {}]   ;;  %s326_s1 = inlined_call_operand.vmem [shape: f32[1,864], index: 1, kind: input, shape index: {}]   ;;  %s327_s2 = inlined_call_operand.<no memory space> [shape: f32[1], index: 2, kind: input, shape index: {}]   ;;  %s328_s3 = inlined_call_operand.hbm [shape: f32[1,1], index: 3, kind: output, shape index: {}]  }
   0x1   :  { %10 = vsyncpa [#allocation6], 0  ;;  %s254_s12 = smov [#allocation4]   ;;  %s206_s16 = scalar_lea.hbm %s325_s0, 896 }
   0x2   :  { %s17_s13 = sshll.u32 %s254_s12, 4  ;;  %p207_p0 = scmp.ne.s32.totalorder %s325_s0, %s206_s16  ;;  %s18_s13 = int_to_ptr.vmem [resolvable:$true] %s17_s13 }
   0x3   :  { %p210_p1 = scmp.lt.u32.totalorder %s206_s16, %s325_s0 }
   0x5   :  { %p212_p2 = pnand %p210_p1, %p207_p0 }
   0x7   :  { %215 = shalt.err (!%p212_p2)
}
   0x8   :  { %s216_s21 = scalar_lea.vmem %s18_s13, 896  ;;  %p221_p4 = scmp.lt.s32.totalorder %s18_s13, %s18_s13 }
   0x9   :  { %p217_p3 = scmp.ne.s32.totalorder %s18_s13, %s216_s21  ;;  %p222_p5 = scmp.lt.s32.totalorder %s216_s21, %s216_s21 }
   0xb   :  { %p223_p6 = por %p222_p5, %p221_p4 }
   0xd   :  { %p224_p7 = pnand %p223_p6, %p217_p3 }
   0xf   :  { %227 = shalt.err (!%p224_p7)
}
  0x10   :  { %20 = dma.hbm_to_vmem [thread:$0]  %s325_s0, 896, %s18_s13, [#allocation5]  }
  0x11   :  { %250 = dma.done.wait [#allocation5], 896  }
  0x12   :  { %251 = vsyncadd [#allocation5], 4294966400  ;;  %vm38_vm0 = vcmask 785408   ;;  %v124_v0 = vlaneseq  ;;  %v255_v1 = vmov 0.0   ;;  %v40_v3 = vld [vmem:[#allocation4] sm:$0xff]  ;;  %v41_v4 = vld [vmem:[#allocation4 + $0x8] sm:$0xff] }
  0x13   :  { %39 = vst.msk [vmem:[#allocation2 + $0x30] sm:$0xff] %vm38_vm0, %v255_v1  ;;  %v42_v5 = vld [vmem:[#allocation4 + $0x10] sm:$0xff]  ;;  %v43_v6 = vld [vmem:[#allocation4 + $0x18] sm:$0xff]  ;;  %v44_v7 = vld [vmem:[#allocation4 + $0x20] sm:$0xff]  ;;  %v79_v14 = vrot.slane %v40_v3, 4  ;;  %v85_v15 = vrot.slane %v41_v4, 4 }
  0x14   :  { %v290_v2 = vshrl.u32 %v124_v0, 7  ;;  %v45_v8 = vld [vmem:[#allocation4 + $0x28] sm:$0xff]  ;;  %v46_v10 = vld [vmem:[#allocation4 + $0x30] sm:$0xff]  ;;  %v91_v16 = vrot.slane %v42_v5, 4  ;;  %v97_v17 = vrot.slane %v43_v6, 4  ;;  %v103_v18 = vrot.slane %v44_v7, 4 }
  0x15   :  { %v109_v19 = vrot.slane %v45_v8, 4  ;;  %v80_v21 = vadd.f32 %v79_v14, %v40_v3  ;;  %v86_v22 = vadd.f32 %v85_v15, %v41_v4  ;;  %v122_v24 = vld [vmem:[%s326_s1] sm:$0x7f]  ;;  %vm166_vm1 = vcmask 1040384   ;;  %s256_s26 = smov [#allocation7]  }
  0x16   :  { %v126_v9 = vsub.s32 0, %v290_v2  ;;  %v130_v12 = vsub.s32 1, %v290_v2  ;;  %v134_v20 = vsub.s32 2, %v290_v2  ;;  %v92_v23 = vadd.f32 %v91_v16, %v42_v5  ;;  %s194_s27 = sshll.u32 %s256_s26, 4  ;;  %s195_s27 = int_to_ptr.vmem [resolvable:$true] %s194_s27 }
  0x17   :  { %v138_v25 = vsub.s32 3, %v290_v2  ;;  %v98_v26 = vadd.f32 %v97_v17, %v43_v6  ;;  %v104_v27 = vadd.f32 %v103_v18, %v44_v7  ;;  %v110_v28 = vadd.f32 %v109_v19, %v45_v8  ;;  %s228_s28 = scalar_lea.vmem %s195_s27, 16  ;;  %s232_s29 = scalar_lea.vmem %s195_s27, 32 }
  0x18   :  { %v142_v29 = vsub.s32 4, %v290_v2  ;;  %v81_v30 = vrot.slane %v80_v21, 2  ;;  %v87_v31 = vrot.slane %v86_v22, 2  ;;  %v93_v32 = vrot.slane %v92_v23, 2  ;;  %p229_p8 = scmp.ne.s32.totalorder %s195_s27, %s228_s28  ;;  %p233_p9 = scmp.lt.s32.totalorder %s195_s27, %s195_s27 }
  0x19   :  { %v146_v33 = vsub.s32 5, %v290_v2  ;;  %v99_v34 = vrot.slane %v98_v26, 2  ;;  %v105_v35 = vrot.slane %v104_v27, 2  ;;  %v111_v36 = vrot.slane %v110_v28, 2  ;;  %p234_p10 = scmp.lt.s32.totalorder %s232_s29, %s228_s28 }
  0x1a   :  { %v53_v11 = vld [vmem:[#allocation2 + $0x30] sm:$0xff]  ;;  %v127_v37 = vrot.slane %v122_v24, %v126_v9  ;;  %v82_v38 = vadd.f32 %v81_v30, %v80_v21  ;;  %v88_v39 = vadd.f32 %v87_v31, %v86_v22  ;;  %v94_v40 = vadd.f32 %v93_v32, %v92_v23 }
  0x1b   :  { %v60_v13 = vadd.f32 %v53_v11, %v46_v10  ;;  %v131_v41 = vrot.slane %v122_v24, %v130_v12  ;;  %v100_v42 = vadd.f32 %v99_v34, %v98_v26  ;;  %v106_v43 = vadd.f32 %v105_v35, %v104_v27  ;;  %p235_p11 = por %p234_p10, %p233_p9 }
  0x1c   :  { %v112_v44 = vadd.f32 %v111_v36, %v110_v28  ;;  %v135_v45 = vrot.slane %v122_v24, %v134_v20  ;;  %v83_v46 = vrot.slane %v82_v38, 1  ;;  %v89_v47 = vrot.slane %v88_v39, 1 }
  0x1d   :  { %68 = vst.msk [vmem:[#allocation2 + $0x30] sm:$0xff] %vm38_vm0, %v60_v13  ;;  %v95_v48 = vrot.slane %v94_v40, 1  ;;  %v139_v49 = vrot.slane %v122_v24, %v138_v25  ;;  %v101_v51 = vrot.slane %v100_v42, 1  ;;  %v107_v52 = vrot.slane %v106_v43, 1  ;;  %p236_p12 = pnand %p235_p11, %p229_p8 }
  0x1e   :  { %v113_v53 = vrot.slane %v112_v44, 1  ;;  %v143_v54 = vrot.slane %v122_v24, %v142_v29  ;;  %v84_v55 = vadd.f32 %v83_v46, %v82_v38  ;;  %v90_v56 = vadd.f32 %v89_v47, %v88_v39 }
  0x1f   :  { %v96_v57 = vadd.f32 %v95_v48, %v94_v40  ;;  %v102_v59 = vadd.f32 %v101_v51, %v100_v42  ;;  %v108_v60 = vadd.f32 %v107_v52, %v106_v43  ;;  %v147_v62 = vrot.slane %v122_v24, %v146_v33 }
  0x20   :  { %v114_v63 = vadd.f32 %v113_v53, %v112_v44  ;;  %v159_v0 = vmul.f32 %v127_v37, %v84_v55  ;;  %v160_v1 = vmul.f32 %v131_v41, %v90_v56  ;;  %v150_v11 = vsub.s32 6, %v290_v2 }
  0x21   :  { %v161_v3 = vmul.f32 %v135_v45, %v96_v57  ;;  %v162_v5 = vmul.f32 %v139_v49, %v102_v59  ;;  %v163_v6 = vmul.f32 %v143_v54, %v108_v60  ;;  %vm178_vm2 = vcmask 778240  }
  0x22   :  { %v167_v7 = vsel %vm166_vm1, %v159_v0, 0.0  ;;  %v168_v8 = vsel %vm166_vm1, %v160_v1, 0.0  ;;  %v164_v13 = vmul.f32 %v147_v62, %v114_v63  ;;  %v151_v19 = vrot.slane %v122_v24, %v150_v11 }
  0x23   :  { %v170_v9 = vsel %vm166_vm1, %v161_v3, 0.0  ;;  %v169_v12 = vadd.f32 %v168_v8, %v167_v7  ;;  %v172_v14 = vsel %vm166_vm1, %v162_v5, 0.0  ;;  %v174_v17 = vsel %vm166_vm1, %v163_v6, 0.0 }
  0x24   :  { %v78_v50 = vld [vmem:[#allocation2 + $0x30] sm:$0xff]  ;;  %v176_v21 = vsel %vm166_vm1, %v164_v13, 0.0  ;;  %v184_v28 = vstv %s327_s2  ;;  %vm186_vm3 = vcmask 0  }
  0x25   :  { %v115_v58 = vsel %vm38_vm0, %v78_v50, 0.0  ;;  %v171_v16 = vadd.f32 %v170_v9, %v169_v12 }
  0x26   :  { %v116_v61 = vrot.slane %v115_v58, 4 }
  0x27   :  { %v173_v20 = vadd.f32 %v172_v14, %v171_v16 }
  0x28   :  { %v117_v4 = vadd.f32 %v116_v61, %v115_v58 }
  0x29   :  { %v175_v23 = vadd.f32 %v174_v17, %v173_v20 }
  0x2a   :  { %v118_v10 = vrot.slane %v117_v4, 2 }
  0x2b   :  { %v177_v26 = vadd.f32 %v176_v21, %v175_v23 }
  0x2c   :  { %v119_v15 = vadd.f32 %v118_v10, %v117_v4 }
  0x2e   :  { %v120_v18 = vrot.slane %v119_v15, 1 }
  0x30   :  { %v121_v22 = vadd.f32 %v120_v18, %v119_v15 }
  0x32   :  { %v165_v25 = vmul.f32 %v151_v19, %v121_v22 }
  0x34   :  { %v179_v27 = vsel %vm178_vm2, %v165_v25, 0.0 }
  0x35   :  { %v180_v2 = vadd.f32 %v179_v27, %v177_v26 }
  0x37   :  { %181 = vadd.xlane.f32.xlu0 %v180_v2 }
  0xc4   :  { %v182_v29 = vpop.xlane.xlu0 %181 }
  0xc5   :  { %v185_v24 = vadd.f32 %v184_v28, %v182_v29 }
  0xc7   :  { %187 = vst.msk [vmem:[#allocation7] sm:$0x1] %vm186_vm3, %v185_v24 }
  0xc8   :  { %239 = shalt.err (!%p236_p12)
}
  0xc9   :  { %s240_s5 = scalar_lea.hbm %s328_s3, 16 }
  0xca   :  { %p241_p13 = scmp.ne.s32.totalorder %s328_s3, %s240_s5  ;;  %p244_p0 = scmp.lt.u32.totalorder %s240_s5, %s328_s3 }
  0xcc   :  { %p246_p1 = pnand %p244_p0, %p241_p13 }
  0xce   :  { %249 = shalt.err (!%p246_p1)
}
  0xcf   :  { %197 = dma.vmem_to_hbm [thread:$0]  %s195_s27, 16, %s328_s3, [#allocation6]  }
  0xd0   :  { %252 = dma.done.wait [#allocation6], 16  }
  0xd1   :  { %253 = vsyncadd [#allocation6], 4294967280 }
  0xd2   :  { %201 = vsyncpa [#allocation5], 1 }
  0xd3   :  { %202 = vsyncpa [#allocation6], 1 }

</bundles_post_ra>
